<compile_context>
chip_gen: v5e
topology: v5e:2x2
jax: 0.10.0
libtpu: 0.0.40
codegen_flags: <defaults>
</compile_context>

<pallas_src>
import jax
import jax.numpy as jnp
from jax.experimental import pallas as pl
from jax.experimental.pallas import tpu as pltpu

# ----------------------------- configuration -------------------------------
BATCH = 2
C_IN = 4
H = W = 16                      # image spatial size
EMB = 128                       # emb_dim (lane-dense: multiple of 128)
PATCH = 3                       # conv kernel size
STRIDE = 2                      # conv stride
PAD = 1                         # conv padding
POOL_K, POOL_S, POOL_P = 3, 2, 1

K_COL = C_IN * PATCH * PATCH                              # im2col width (36)
H_CONV = (H + 2 * PAD - PATCH) // STRIDE + 1              # 8
W_CONV = (W + 2 * PAD - PATCH) // STRIDE + 1              # 8
H_POOL = (H_CONV + 2 * POOL_P - POOL_K) // POOL_S + 1     # 4
W_POOL = (W_CONV + 2 * POOL_P - POOL_K) // POOL_S + 1     # 4
NPATCH = H_POOL * W_POOL                                  # 16 tokens
NROWS = BATCH * H_CONV * W_CONV                           # 128 GEMM rows


# ------------------------------- kernel ------------------------------------
def tokenizer_kernel(patches_ref, wcol_ref, pos_ref, o_ref):
    # Conv-as-GEMM on the MXU (default precision: one bf16 pass, f32 acc) + ReLU.
    conv = jnp.maximum(
        jnp.dot(patches_ref[...], wcol_ref[...],
                preferred_element_type=jnp.float32),
        0.0)                                              # (B*Hc*Wc, EMB) = (128, 128)
    # Rows are (b, hc, wc) row-major -> layout-trivial split of the row axis.
    conv = conv.reshape(BATCH * H_CONV, W_CONV, EMB)      # (16, 8, 128)

    # ---- separable MaxPool2d(k=3, s=2, p=1), stage 1: along W --------------
    # Window clipping == implicit -inf padding. 8 sublane extracts + 7 maxima
    # on full (16, 128) slabs (2 fully-occupied vregs each).
    cols = [conv[:, c, :] for c in range(W_CONV)]          # each (B*Hc, EMB)
    wp = []
    for ow in range(W_POOL):
        c0 = max(0, POOL_S * ow - POOL_P)
        c1 = min(W_CONV - 1, POOL_S * ow - POOL_P + POOL_K - 1)
        m = cols[c0]
        for c in range(c0 + 1, c1 + 1):
            m = jnp.maximum(m, cols[c])
        wp.append(m)                                       # (B*Hc, EMB)

    # (B*Hc, W_POOL, EMB): leading-dim split to (B, Hc, W_POOL, EMB) is free.
    wstack = jnp.stack(wp, axis=-2).reshape(BATCH, H_CONV, W_POOL, EMB)

    # ---- stage 2: along H. 8 extracts + 7 maxima on (B, W_POOL, EMB) slabs --
    pos = pos_ref[...]                                     # (NPATCH, EMB), hoisted
    rows = [wstack[:, r, :, :] for r in range(H_CONV)]     # each (B, W_POOL, EMB)
    for oh in range(H_POOL):
        r0 = max(0, POOL_S * oh - POOL_P)
        r1 = min(H_CONV - 1, POOL_S * oh - POOL_P + POOL_K - 1)
        m = rows[r0]
        for r in range(r0 + 1, r1 + 1):
            m = jnp.maximum(m, rows[r])
        # Fold in the positional embedding and write tokens
        # [oh*W_POOL, oh*W_POOL+W_POOL) straight into the output block.
        t0 = oh * W_POOL
        o_ref[:, t0:t0 + W_POOL, :] = m + pos[t0:t0 + W_POOL, :][None]
    # TODO(synk): dropout (p=0 / eval mode) is an identity and is omitted;
    # pos_emb modes 'learn'/'none' are not exercised (default 'sine' only).


# ------------------------------- wrapper ------------------------------------
def _im2col(x):
    """Host-side layout plumbing: zero-pad + extract conv patches.

    Returns (B*Hc*Wc, C*k*k) with column order (c, kh, kw) and rows ordered
    (b, hc, wc) row-major.

    Note: fine at this size; at larger H/W/B, avoid the k*k=9x HBM read
    amplification by DMA-ing the padded image into VMEM and accumulating nine
    shifted matmuls inside the kernel instead.
    """
    xp = jnp.pad(x, ((0, 0), (0, 0), (PAD, PAD), (PAD, PAD)))
    taps = []
    for kh in range(PATCH):
        for kw in range(PATCH):
            taps.append(xp[:, :,
                           kh:kh + STRIDE * H_CONV:STRIDE,
                           kw:kw + STRIDE * W_CONV:STRIDE])   # (B, C, Hc, Wc)
    p = jnp.stack(taps, axis=2)                               # (B, C, 9, Hc, Wc)
    p = p.transpose(0, 3, 4, 1, 2)                            # (B, Hc, Wc, C, 9)
    return p.reshape(NROWS, K_COL)


@jax.jit
def tokenizer_forward(x, conv_w, pos):
    patches = _im2col(x)                                      # (128, 36)
    # Conv weight (EMB, C, kh, kw) -> (C*kh*kw, EMB), matching patch columns.
    wcol = conv_w.transpose(1, 2, 3, 0).reshape(K_COL, EMB)

    # No grid: single invocation, whole arrays resident in VMEM (total VMEM
    # footprint < 0.2 MiB, far below any chip's limit).
    return pl.pallas_call(
        tokenizer_kernel,
        out_shape=jax.ShapeDtypeStruct((BATCH, NPATCH, EMB), jnp.float32),
        in_specs=[
            pl.BlockSpec(memory_space=pltpu.MemorySpace.VMEM),
            pl.BlockSpec(memory_space=pltpu.MemorySpace.VMEM),
            pl.BlockSpec(memory_space=pltpu.MemorySpace.VMEM),
        ],
        out_specs=pl.BlockSpec(memory_space=pltpu.MemorySpace.VMEM),
    )(patches, wcol, pos)


# --------------------------- pure-JAX reference ------------------------------
def sinusoidal_embedding(num_channels, dim):
    p = jnp.arange(num_channels, dtype=jnp.float32)[:, None]
    i = jnp.arange(dim, dtype=jnp.float32)[None, :]
    angles = p / jnp.power(10000.0, 2.0 * jnp.floor(i / 2.0) / dim)
    even = (jnp.arange(dim) % 2 == 0)[None, :]
    return jnp.where(even, jnp.sin(angles), jnp.cos(angles))  # (num_channels, dim)


def reference(x, conv_w, pos):
    conv = jax.lax.conv_general_dilated(
        x, conv_w, window_strides=(STRIDE, STRIDE),
        padding=((PAD, PAD), (PAD, PAD)),
        dimension_numbers=("NCHW", "OIHW", "NCHW"))
    conv = jnp.maximum(conv, 0.0)
    pooled = jax.lax.reduce_window(
        conv, -jnp.inf, jax.lax.max,
        window_dimensions=(1, 1, POOL_K, POOL_K),
        window_strides=(1, 1, POOL_S, POOL_S),
        padding=((0, 0), (0, 0), (POOL_P, POOL_P), (POOL_P, POOL_P)))
    tokens = pooled.transpose(0, 2, 3, 1).reshape(BATCH, NPATCH, EMB)
    return tokens + pos[None]


# --------------------------------- main -------------------------------------
if __name__ == "__main__":
    key = jax.random.PRNGKey(0)
    kx, kw = jax.random.split(key)

    x = jax.random.normal(kx, (BATCH, C_IN, H, W), dtype=jnp.float32)

    # Kaiming-normal-like conv weight (fan_in = C*k*k), no bias (use_bias=False).
    fan_in = C_IN * PATCH * PATCH
    conv_w = jax.random.normal(kw, (EMB, C_IN, PATCH, PATCH), jnp.float32)
    conv_w = conv_w * (2.0 / fan_in) ** 0.5

    pos = sinusoidal_embedding(NPATCH, EMB)                   # (16, 128)

    out = jax.block_until_ready(tokenizer_forward(x, conv_w, pos))
    ref = reference(x, conv_w, pos)

    assert out.shape == (BATCH, NPATCH, EMB)
    # Tolerance covers the deliberate default-precision (bf16-input MXU) GEMM
    # vs. the XLA conv reference; errors are far smaller in practice.
    assert jnp.allclose(out, ref, rtol=2e-2, atol=2e-2), (
        "mismatch vs reference, max abs err = "
        f"{float(jnp.max(jnp.abs(out - ref)))}")

    print("KERNEL_OK")
</pallas_src>

<mosaic_0001>
module attributes {stable_mosaic.version = 11 : i64} {
  func.func @tokenizer_kernel(%arg0: memref<128x36xf32, #tpu.memory_space<vmem>>, %arg1: memref<36x128xf32, #tpu.memory_space<vmem>>, %arg2: memref<16x128xf32, #tpu.memory_space<vmem>>, %arg3: memref<2x16x128xf32, #tpu.memory_space<vmem>>) attributes {dimension_semantics = [], scalar_prefetch = 0 : i64, scratch_operands = 0 : i64, tpu.core_type = #tpu.core_type<tc>} {
    %c0 = arith.constant 0 : index
    %c0_0 = arith.constant 0 : index
    %0 = vector.load %arg0[%c0, %c0_0] : memref<128x36xf32, #tpu.memory_space<vmem>>, vector<128x36xf32>
    %c0_1 = arith.constant 0 : index
    %c0_2 = arith.constant 0 : index
    %1 = vector.load %arg1[%c0_1, %c0_2] : memref<36x128xf32, #tpu.memory_space<vmem>>, vector<36x128xf32>
    %cst = arith.constant dense<0.000000e+00> : vector<128x128xf32>
    %2 = tpu.matmul %0, %1, %cst {dimension_numbers = #tpu.dot_dimension_numbers<[1], [0], [0], [1], [0, 0, 1, 1], [], []>} : vector<128x36xf32>, vector<36x128xf32>, vector<128x128xf32> -> vector<128x128xf32>
    %cst_3 = arith.constant 0.000000e+00 : f32
    %3 = vector.broadcast %cst_3 : f32 to vector<128x128xf32>
    %4 = arith.maximumf %2, %3 : vector<128x128xf32>
    %5 = vector.shape_cast %4 : vector<128x128xf32> to vector<16x8x128xf32>
    %6 = vector.extract_strided_slice %5 {offsets = [0, 0, 0], sizes = [16, 1, 128], strides = [1, 1, 1]} : vector<16x8x128xf32> to vector<16x1x128xf32>
    %7 = vector.shape_cast %6 : vector<16x1x128xf32> to vector<16x128xf32>
    %8 = vector.extract_strided_slice %5 {offsets = [0, 1, 0], sizes = [16, 1, 128], strides = [1, 1, 1]} : vector<16x8x128xf32> to vector<16x1x128xf32>
    %9 = vector.shape_cast %8 : vector<16x1x128xf32> to vector<16x128xf32>
    %10 = vector.extract_strided_slice %5 {offsets = [0, 2, 0], sizes = [16, 1, 128], strides = [1, 1, 1]} : vector<16x8x128xf32> to vector<16x1x128xf32>
    %11 = vector.shape_cast %10 : vector<16x1x128xf32> to vector<16x128xf32>
    %12 = vector.extract_strided_slice %5 {offsets = [0, 3, 0], sizes = [16, 1, 128], strides = [1, 1, 1]} : vector<16x8x128xf32> to vector<16x1x128xf32>
    %13 = vector.shape_cast %12 : vector<16x1x128xf32> to vector<16x128xf32>
    %14 = vector.extract_strided_slice %5 {offsets = [0, 4, 0], sizes = [16, 1, 128], strides = [1, 1, 1]} : vector<16x8x128xf32> to vector<16x1x128xf32>
    %15 = vector.shape_cast %14 : vector<16x1x128xf32> to vector<16x128xf32>
    %16 = vector.extract_strided_slice %5 {offsets = [0, 5, 0], sizes = [16, 1, 128], strides = [1, 1, 1]} : vector<16x8x128xf32> to vector<16x1x128xf32>
    %17 = vector.shape_cast %16 : vector<16x1x128xf32> to vector<16x128xf32>
    %18 = vector.extract_strided_slice %5 {offsets = [0, 6, 0], sizes = [16, 1, 128], strides = [1, 1, 1]} : vector<16x8x128xf32> to vector<16x1x128xf32>
    %19 = vector.shape_cast %18 : vector<16x1x128xf32> to vector<16x128xf32>
    %20 = vector.extract_strided_slice %5 {offsets = [0, 7, 0], sizes = [16, 1, 128], strides = [1, 1, 1]} : vector<16x8x128xf32> to vector<16x1x128xf32>
    %21 = vector.shape_cast %20 : vector<16x1x128xf32> to vector<16x128xf32>
    %22 = arith.maximumf %7, %9 : vector<16x128xf32>
    %23 = arith.maximumf %9, %11 : vector<16x128xf32>
    %24 = arith.maximumf %23, %13 : vector<16x128xf32>
    %25 = arith.maximumf %13, %15 : vector<16x128xf32>
    %26 = arith.maximumf %25, %17 : vector<16x128xf32>
    %27 = arith.maximumf %17, %19 : vector<16x128xf32>
    %28 = arith.maximumf %27, %21 : vector<16x128xf32>
    %29 = vector.shape_cast %22 : vector<16x128xf32> to vector<16x1x128xf32>
    %30 = vector.shape_cast %24 : vector<16x128xf32> to vector<16x1x128xf32>
    %31 = vector.shape_cast %26 : vector<16x128xf32> to vector<16x1x128xf32>
    %32 = vector.shape_cast %28 : vector<16x128xf32> to vector<16x1x128xf32>
    %33 = tpu.concatenate %29, %30, %31, %32 in 1 : vector<16x1x128xf32>, vector<16x1x128xf32>, vector<16x1x128xf32>, vector<16x1x128xf32> -> vector<16x4x128xf32>
    %34 = vector.shape_cast %33 : vector<16x4x128xf32> to vector<2x8x4x128xf32>
    %c0_4 = arith.constant 0 : index
    %c0_5 = arith.constant 0 : index
    %35 = vector.load %arg2[%c0_4, %c0_5] : memref<16x128xf32, #tpu.memory_space<vmem>>, vector<16x128xf32>
    %36 = vector.extract_strided_slice %34 {offsets = [0, 0, 0, 0], sizes = [2, 1, 4, 128], strides = [1, 1, 1, 1]} : vector<2x8x4x128xf32> to vector<2x1x4x128xf32>
    %37 = vector.shape_cast %36 : vector<2x1x4x128xf32> to vector<2x4x128xf32>
    %38 = vector.extract_strided_slice %34 {offsets = [0, 1, 0, 0], sizes = [2, 1, 4, 128], strides = [1, 1, 1, 1]} : vector<2x8x4x128xf32> to vector<2x1x4x128xf32>
    %39 = vector.shape_cast %38 : vector<2x1x4x128xf32> to vector<2x4x128xf32>
    %40 = vector.extract_strided_slice %34 {offsets = [0, 2, 0, 0], sizes = [2, 1, 4, 128], strides = [1, 1, 1, 1]} : vector<2x8x4x128xf32> to vector<2x1x4x128xf32>
    %41 = vector.shape_cast %40 : vector<2x1x4x128xf32> to vector<2x4x128xf32>
    %42 = vector.extract_strided_slice %34 {offsets = [0, 3, 0, 0], sizes = [2, 1, 4, 128], strides = [1, 1, 1, 1]} : vector<2x8x4x128xf32> to vector<2x1x4x128xf32>
    %43 = vector.shape_cast %42 : vector<2x1x4x128xf32> to vector<2x4x128xf32>
    %44 = vector.extract_strided_slice %34 {offsets = [0, 4, 0, 0], sizes = [2, 1, 4, 128], strides = [1, 1, 1, 1]} : vector<2x8x4x128xf32> to vector<2x1x4x128xf32>
    %45 = vector.shape_cast %44 : vector<2x1x4x128xf32> to vector<2x4x128xf32>
    %46 = vector.extract_strided_slice %34 {offsets = [0, 5, 0, 0], sizes = [2, 1, 4, 128], strides = [1, 1, 1, 1]} : vector<2x8x4x128xf32> to vector<2x1x4x128xf32>
    %47 = vector.shape_cast %46 : vector<2x1x4x128xf32> to vector<2x4x128xf32>
    %48 = vector.extract_strided_slice %34 {offsets = [0, 6, 0, 0], sizes = [2, 1, 4, 128], strides = [1, 1, 1, 1]} : vector<2x8x4x128xf32> to vector<2x1x4x128xf32>
    %49 = vector.shape_cast %48 : vector<2x1x4x128xf32> to vector<2x4x128xf32>
    %50 = vector.extract_strided_slice %34 {offsets = [0, 7, 0, 0], sizes = [2, 1, 4, 128], strides = [1, 1, 1, 1]} : vector<2x8x4x128xf32> to vector<2x1x4x128xf32>
    %51 = vector.shape_cast %50 : vector<2x1x4x128xf32> to vector<2x4x128xf32>
    %52 = arith.maximumf %37, %39 : vector<2x4x128xf32>
    %53 = vector.extract_strided_slice %35 {offsets = [0, 0], sizes = [4, 128], strides = [1, 1]} : vector<16x128xf32> to vector<4x128xf32>
    %54 = vector.shape_cast %53 : vector<4x128xf32> to vector<1x4x128xf32>
    %55 = vector.broadcast %54 : vector<1x4x128xf32> to vector<2x4x128xf32>
    %56 = arith.addf %52, %55 : vector<2x4x128xf32>
    %c0_6 = arith.constant 0 : index
    %c0_7 = arith.constant 0 : index
    %c0_8 = arith.constant 0 : index
    %57 = vector.load %arg3[%c0_6, %c0_7, %c0_8] : memref<2x16x128xf32, #tpu.memory_space<vmem>>, vector<2x4x128xf32>
    tpu.vector_store %arg3[%c0_6, %c0_7, %c0_8], %56 {strides = array<i32>} : memref<2x16x128xf32, #tpu.memory_space<vmem>>, vector<2x4x128xf32>,
    %58 = arith.maximumf %39, %41 : vector<2x4x128xf32>
    %59 = arith.maximumf %58, %43 : vector<2x4x128xf32>
    %60 = vector.extract_strided_slice %35 {offsets = [4, 0], sizes = [4, 128], strides = [1, 1]} : vector<16x128xf32> to vector<4x128xf32>
    %61 = vector.shape_cast %60 : vector<4x128xf32> to vector<1x4x128xf32>
    %62 = vector.broadcast %61 : vector<1x4x128xf32> to vector<2x4x128xf32>
    %63 = arith.addf %59, %62 : vector<2x4x128xf32>
    %c0_9 = arith.constant 0 : index
    %c4 = arith.constant 4 : index
    %c0_10 = arith.constant 0 : index
    %64 = vector.load %arg3[%c0_9, %c4, %c0_10] : memref<2x16x128xf32, #tpu.memory_space<vmem>>, vector<2x4x128xf32>
    tpu.vector_store %arg3[%c0_9, %c4, %c0_10], %63 {strides = array<i32>} : memref<2x16x128xf32, #tpu.memory_space<vmem>>, vector<2x4x128xf32>,
    %65 = arith.maximumf %43, %45 : vector<2x4x128xf32>
    %66 = arith.maximumf %65, %47 : vector<2x4x128xf32>
    %67 = vector.extract_strided_slice %35 {offsets = [8, 0], sizes = [4, 128], strides = [1, 1]} : vector<16x128xf32> to vector<4x128xf32>
    %68 = vector.shape_cast %67 : vector<4x128xf32> to vector<1x4x128xf32>
    %69 = vector.broadcast %68 : vector<1x4x128xf32> to vector<2x4x128xf32>
    %70 = arith.addf %66, %69 : vector<2x4x128xf32>
    %c0_11 = arith.constant 0 : index
    %c8 = arith.constant 8 : index
    %c0_12 = arith.constant 0 : index
    %71 = vector.load %arg3[%c0_11, %c8, %c0_12] : memref<2x16x128xf32, #tpu.memory_space<vmem>>, vector<2x4x128xf32>
    tpu.vector_store %arg3[%c0_11, %c8, %c0_12], %70 {strides = array<i32>} : memref<2x16x128xf32, #tpu.memory_space<vmem>>, vector<2x4x128xf32>,
    %72 = arith.maximumf %47, %49 : vector<2x4x128xf32>
    %73 = arith.maximumf %72, %51 : vector<2x4x128xf32>
    %74 = vector.extract_strided_slice %35 {offsets = [12, 0], sizes = [4, 128], strides = [1, 1]} : vector<16x128xf32> to vector<4x128xf32>
    %75 = vector.shape_cast %74 : vector<4x128xf32> to vector<1x4x128xf32>
    %76 = vector.broadcast %75 : vector<1x4x128xf32> to vector<2x4x128xf32>
    %77 = arith.addf %73, %76 : vector<2x4x128xf32>
    %c0_13 = arith.constant 0 : index
    %c12 = arith.constant 12 : index
    %c0_14 = arith.constant 0 : index
    %78 = vector.load %arg3[%c0_13, %c12, %c0_14] : memref<2x16x128xf32, #tpu.memory_space<vmem>>, vector<2x4x128xf32>
    tpu.vector_store %arg3[%c0_13, %c12, %c0_14], %77 {strides = array<i32>} : memref<2x16x128xf32, #tpu.memory_space<vmem>>, vector<2x4x128xf32>,
    return
  }
}

</mosaic_0001>

<bundles_post_ra>
// kernel: tokenizer_forward.1
= control target key start
LH: loop header
LB: loop body
LE: loop exit
PB: predicated region body
PF: predicated region fallthrough
CT: control target
= control target key end

     0   :  { %vm85_vm0 = vcmask 1043456   ;;  %s738_s0 = inlined_call_operand.vmem [shape: f32[128,36], index: 0, kind: input, shape index: {}]   ;;  %s739_s1 = inlined_call_operand.vmem [shape: f32[36,128], index: 1, kind: input, shape index: {}]   ;;  %s740_s2 = inlined_call_operand.vmem [shape: f32[16,128], index: 2, kind: input, shape index: {}]   ;;  %s741_s3 = inlined_call_operand.hbm [shape: f32[2,16,128], index: 3, kind: output, shape index: {}]  }
   0x1   :  { %v35_v0 = vld [vmem:[%s739_s1 + $0x20] sm:$0xf]  ;;  %v34_v1 = vld [vmem:[%s739_s1 + $0x18] sm:$0xff]  ;;  %v33_v2 = vld [vmem:[%s739_s1 + $0x10] sm:$0xff] }
   0x2   :  { %469 = vmatpush.msk.msra.mxu0 %vm85_vm0, %v35_v0  ;;  %486 = vmatpush.msk.msra.mxu1 %vm85_vm0, %v35_v0  ;;  %v32_v3 = vld [vmem:[%s739_s1 + $0x8] sm:$0xff]  ;;  %v31_v4 = vld [vmem:[%s739_s1] sm:$0xff] }
   0x3   :  { %487 = vmatpush.msk.msra.mxu2 %vm85_vm0, %v35_v0  ;;  %488 = vmatpush.msk.msra.mxu3 %vm85_vm0, %v35_v0 }
   0x4   :  { %101 = vmatpush.msra.mxu0 %v34_v1  ;;  %489 = vmatpush.msra.mxu1 %v34_v1 }
   0x5   :  { %490 = vmatpush.msra.mxu2 %v34_v1  ;;  %491 = vmatpush.msra.mxu3 %v34_v1 }
   0x6   :  { %102 = vmatpush.msra.mxu0 %v33_v2  ;;  %492 = vmatpush.msra.mxu1 %v33_v2 }
   0x7   :  { %493 = vmatpush.msra.mxu2 %v33_v2  ;;  %494 = vmatpush.msra.mxu3 %v33_v2 }
   0x8   :  { %103 = vmatpush.msra.mxu0 %v32_v3  ;;  %495 = vmatpush.msra.mxu1 %v32_v3 }
   0x9   :  { %8 = vsyncpa [#allocation3], 0  ;;  %496 = vmatpush.msra.mxu2 %v32_v3  ;;  %497 = vmatpush.msra.mxu3 %v32_v3  ;;  %v15_v5 = vld [vmem:[%s738_s0] sm:$0xff]  ;;  %vm36_vm1 = vcmask 293888   ;;  %v16_v9 = vld [vmem:[%s738_s0 + $0x8] sm:$0xff]  ;;  %vm362_vm2 = vcmask 1040384  }
   0xa   :  { %v19_v6 = vld [vmem:[%s738_s0 + $0x20] sm:$0xff]  ;;  %104 = vmatpush.msra.mxu0 %v31_v4  ;;  %498 = vmatpush.msra.mxu1 %v31_v4  ;;  %v20_v10 = vld [vmem:[%s738_s0 + $0x28] sm:$0xff]  ;;  %v17_v13 = vld [vmem:[%s738_s0 + $0x10] sm:$0xff]  ;;  %vm379_vm3 = vcmask 1041408   ;;  %vm396_vm4 = vcmask 1042432   ;;  %s457_s4 = sshll.u32 %s741_s3, 4  ;;  %s458_s4 = int_to_ptr.hbm [resolvable:$true] %s457_s4 }
   0xb   :  { %v23_v7 = vld [vmem:[%s738_s0 + $0x40] sm:$0xff]  ;;  %499 = vmatpush.msra.mxu2 %v31_v4  ;;  %500 = vmatpush.msra.mxu3 %v31_v4  ;;  %v24_v11 = vld [vmem:[%s738_s0 + $0x48] sm:$0xff]  ;;  %v21_v14 = vld [vmem:[%s738_s0 + $0x30] sm:$0xff]  ;;  %s531_s5 = smov 128   ;;  %s532_s6 = smov 8  }
   0xc   :  { %v27_v8 = vld [vmem:[%s738_s0 + $0x60] sm:$0xff]  ;;  %470 = vmatmul.msk.f32.vlgmr.msra.gmra.mxu0 %vm36_vm1, %v15_v5  ;;  %474 = vmatmul.msk.f32.vlgmr.msra.gmra.mxu1 %vm36_vm1, %v19_v6  ;;  %v28_v12 = vld [vmem:[%s738_s0 + $0x68] sm:$0xff]  ;;  %v25_v15 = vld [vmem:[%s738_s0 + $0x50] sm:$0xff] }
   0xd   :  { %478 = vmatmul.msk.f32.vlgmr.msra.gmra.mxu2 %vm36_vm1, %v23_v7  ;;  %482 = vmatmul.msk.f32.vlgmr.msra.gmra.mxu3 %vm36_vm1, %v27_v8  ;;  %v29_v16 = vld [vmem:[%s738_s0 + $0x70] sm:$0xff]  ;;  %v18_v17 = vld [vmem:[%s738_s0 + $0x18] sm:$0xff]  ;;  %v643_v6 = vld [vmem:[%s740_s2] sm:$0xff] }
   0xe   :  { %v22_v18 = vld [vmem:[%s738_s0 + $0x38] sm:$0xff] }
   0xf   :  { %v26_v19 = vld [vmem:[%s738_s0 + $0x58] sm:$0xff] }
  0x10   :  { %v30_v20 = vld [vmem:[%s738_s0 + $0x78] sm:$0xff] }
  0x14   :  { %471 = vmatmul.msk.f32.gmra.mxu0 %vm36_vm1, %v16_v9  ;;  %475 = vmatmul.msk.f32.gmra.mxu1 %vm36_vm1, %v20_v10 }
  0x15   :  { %479 = vmatmul.msk.f32.gmra.mxu2 %vm36_vm1, %v24_v11  ;;  %483 = vmatmul.msk.f32.gmra.mxu3 %vm36_vm1, %v28_v12  ;;  %v426_v12 = vrot.slane %v643_v6, 4 }
  0x1c   :  { %472 = vmatmul.msk.f32.gmra.mxu0 %vm36_vm1, %v17_v13  ;;  %476 = vmatmul.msk.f32.gmra.mxu1 %vm36_vm1, %v21_v14 }
  0x1d   :  { %480 = vmatmul.msk.f32.gmra.mxu2 %vm36_vm1, %v25_v15  ;;  %484 = vmatmul.msk.f32.gmra.mxu3 %vm36_vm1, %v29_v16 }
  0x24   :  { %473 = vmatmul.msk.f32.gmra.mxu0 %vm36_vm1, %v18_v17  ;;  %477 = vmatmul.msk.f32.gmra.mxu1 %vm36_vm1, %v22_v18 }
  0x25   :  { %481 = vmatmul.msk.f32.gmra.mxu2 %vm36_vm1, %v26_v19  ;;  %485 = vmatmul.msk.f32.gmra.mxu3 %vm36_vm1, %v30_v20 }
  0x89   :  { %v106_v21 = vpop.f32.mrf.mxu0  ;;  %v118_v22 = vpop.f32.mrf.mxu1 }
  0x8a   :  { %v154_v23 = vmax.f32 %v106_v21, 0.0  ;;  %v158_v24 = vmax.f32 %v118_v22, 0.0 }
  0x8c   :  { %v186_v25 = vrot.slane %v154_v23, 1  ;;  %v234_v26 = vrot.slane %v154_v23, 2  ;;  %v190_v27 = vrot.slane %v158_v24, 1  ;;  %v238_v28 = vrot.slane %v158_v24, 2 }
  0x8e   :  { %v218_v29 = vmax.f32 %v154_v23, %v186_v25  ;;  %v222_v30 = vmax.f32 %v158_v24, %v190_v27 }
  0x90   :  { %v266_v31 = vmax.f32 %v218_v29, %v234_v26  ;;  %v270_v32 = vmax.f32 %v222_v30, %v238_v28  ;;  %v130_v33 = vpop.f32.mrf.mxu2  ;;  %v142_v34 = vpop.f32.mrf.mxu3 }
  0x91   :  { %v162_v35 = vmax.f32 %v130_v33, 0.0  ;;  %v166_v36 = vmax.f32 %v142_v34, 0.0  ;;  %v109_v37 = vpop.f32.mrf.mxu0  ;;  %v121_v47 = vpop.f32.mrf.mxu1 }
  0x92   :  { %v298_v38 = vrot.slane %v266_v31, 1  ;;  %v363_v40 = vsel %vm362_vm2, %v218_v29, %v266_v31  ;;  %v302_v41 = vrot.slane %v270_v32, 1  ;;  %v155_v46 = vmax.f32 %v109_v37, 0.0 }
  0x93   :  { %v194_v39 = vrot.slane %v162_v35, 1  ;;  %v198_v42 = vrot.slane %v166_v36, 1  ;;  %v242_v44 = vrot.slane %v162_v35, 2  ;;  %v246_v45 = vrot.slane %v166_v36, 2 }
  0x94   :  { %v330_v48 = vrot.slane %v266_v31, 2  ;;  %v367_v49 = vsel %vm362_vm2, %v222_v30, %v270_v32  ;;  %v159_v51 = vmax.f32 %v121_v47, 0.0  ;;  %v380_v52 = vsel %vm379_vm3, %v363_v40, %v298_v38 }
  0x95   :  { %v226_v43 = vmax.f32 %v162_v35, %v194_v39  ;;  %v230_v50 = vmax.f32 %v166_v36, %v198_v42  ;;  %v187_v54 = vrot.slane %v155_v46, 1  ;;  %v235_v55 = vrot.slane %v155_v46, 2 }
  0x96   :  { %v334_v56 = vrot.slane %v270_v32, 2  ;;  %v191_v57 = vrot.slane %v159_v51, 1  ;;  %v384_v60 = vsel %vm379_vm3, %v367_v49, %v302_v41  ;;  %v397_v0 = vsel %vm396_vm4, %v380_v52, %v330_v48 }
  0x97   :  { %v274_v53 = vmax.f32 %v226_v43, %v242_v44  ;;  %v636_v61 = vmax.f32 %v230_v50, %v246_v45  ;;  %v219_v62 = vmax.f32 %v155_v46, %v187_v54  ;;  %v239_v3 = vrot.slane %v159_v51, 2 }
  0x98   :  { %v133_v58 = vpop.f32.mrf.mxu2  ;;  %v145_v59 = vpop.f32.mrf.mxu3  ;;  %v223_v2 = vmax.f32 %v159_v51, %v191_v57  ;;  %v646_v9 = vsel %vm396_vm4, %v384_v60, %v334_v56 }
  0x99   :  { %v112_v63 = vpop.f32.mrf.mxu0  ;;  %v306_v1 = vrot.slane %v274_v53, 1  ;;  %v371_v4 = vsel %vm362_vm2, %v226_v43, %v274_v53  ;;  %v267_v5 = vmax.f32 %v219_v62, %v235_v55  ;;  %v163_v7 = vmax.f32 %v133_v58, 0.0  ;;  %v124_v25 = vpop.f32.mrf.mxu1 }
  0x9a   :  { %v167_v8 = vmax.f32 %v145_v59, 0.0  ;;  %v338_v10 = vrot.slane %v274_v53, 2  ;;  %v156_v11 = vmax.f32 %v112_v63, 0.0  ;;  %v310_v13 = vrot.slane %v636_v61, 1 }
  0x9b   :  { %v299_v14 = vrot.slane %v267_v5, 1  ;;  %v331_v15 = vrot.slane %v267_v5, 2  ;;  %v364_v16 = vsel %vm362_vm2, %v219_v62, %v267_v5  ;;  %v388_v17 = vsel %vm379_vm3, %v371_v4, %v306_v1 }
  0x9c   :  { %v342_v18 = vrot.slane %v636_v61, 2  ;;  %v653_v19 = vmax.f32 %v223_v2, %v239_v3  ;;  %v195_v20 = vrot.slane %v163_v7, 1  ;;  %v375_v21 = vsel %vm362_vm2, %v230_v50, %v636_v61 }
  0x9d   :  { %v381_v22 = vsel %vm379_vm3, %v364_v16, %v299_v14  ;;  %v199_v23 = vrot.slane %v167_v8, 1  ;;  %v247_v24 = vrot.slane %v167_v8, 2  ;;  %v243_v28 = vrot.slane %v163_v7, 2 }
  0x9e   :  { %v659_v26 = vsel %vm396_vm4, %v381_v22, %v331_v15  ;;  %v227_v27 = vmax.f32 %v163_v7, %v195_v20  ;;  %v188_v29 = vrot.slane %v156_v11, 1  ;;  %v405_v31 = vsel %vm396_vm4, %v388_v17, %v338_v10 }
  0x9f   :  { %v415_v32 = vmax.f32 %v397_v0, %v659_v26  ;;  %v231_v33 = vmax.f32 %v167_v8, %v199_v23  ;;  %v236_v34 = vrot.slane %v156_v11, 2  ;;  %v303_v35 = vrot.slane %v653_v19, 1 }
  0xa0   :  { %v136_v30 = vpop.f32.mrf.mxu2  ;;  %v275_v36 = vmax.f32 %v227_v27, %v243_v28  ;;  %v220_v37 = vmax.f32 %v156_v11, %v188_v29  ;;  %v160_v38 = vmax.f32 %v124_v25, 0.0  ;;  %v148_v39 = vpop.f32.mrf.mxu3  ;;  %v368_v41 = vsel %vm362_vm2, %v223_v2, %v653_v19  ;;  %v695_v28 = vld [vmem:[%s740_s2 + $0x8] sm:$0xff]  ;;  %s530_s2 = smov [#allocation2]  }
  0xa1   :  { %v417_v40 = vadd.f32 %v415_v32, %v643_v6  ;;  %v667_v42 = vmax.f32 %v231_v33, %v247_v24  ;;  %v164_v43 = vmax.f32 %v136_v30, 0.0  ;;  %v115_v48 = vpop.f32.mrf.mxu0  ;;  %v392_v49 = vsel %vm379_vm3, %v375_v21, %v310_v13  ;;  %v127_v7 = vpop.f32.mrf.mxu1  ;;  %s455_s28 = sshll.u32 %s530_s2, 4  ;;  %s456_s28 = int_to_ptr.vmem [resolvable:$true] %s455_s28 }
  0xa2   :  { %v307_v44 = vrot.slane %v275_v36, 1  ;;  %v339_v45 = vrot.slane %v275_v36, 2  ;;  %v372_v46 = vsel %vm362_vm2, %v227_v27, %v275_v36  ;;  %v268_v47 = vmax.f32 %v220_v37, %v236_v34 }
  0xa3   :  { %419 = vst [vmem:[#allocation2] sm:$0xf] %v417_v40  ;;  %v335_v50 = vrot.slane %v653_v19, 2  ;;  %v192_v51 = vrot.slane %v160_v38, 1  ;;  %v168_v52 = vmax.f32 %v148_v39, 0.0  ;;  %v385_v53 = vsel %vm379_vm3, %v368_v41, %v303_v35 }
  0xa4   :  { %v389_v54 = vsel %vm379_vm3, %v372_v46, %v307_v44  ;;  %v300_v55 = vrot.slane %v268_v47, 1  ;;  %v365_v56 = vsel %vm362_vm2, %v220_v37, %v268_v47  ;;  %v240_v59 = vrot.slane %v160_v38, 2 }
  0xa5   :  { %v676_v57 = vsel %vm396_vm4, %v389_v54, %v339_v45  ;;  %v224_v58 = vmax.f32 %v160_v38, %v192_v51  ;;  %v157_v60 = vmax.f32 %v115_v48, 0.0  ;;  %v311_v63 = vrot.slane %v667_v42, 1 }
  0xa6   :  { %v416_v62 = vmax.f32 %v405_v31, %v676_v57  ;;  %v332_v0 = vrot.slane %v268_v47, 2  ;;  %v196_v1 = vrot.slane %v164_v43, 1  ;;  %v376_v2 = vsel %vm362_vm2, %v231_v33, %v667_v42 }
  0xa7   :  { %v382_v3 = vsel %vm379_vm3, %v365_v56, %v300_v55  ;;  %v272_v4 = vmax.f32 %v224_v58, %v240_v59  ;;  %v200_v5 = vrot.slane %v168_v52, 1  ;;  %v244_v11 = vrot.slane %v164_v43, 2 }
  0xa8   :  { %v418_v8 = vadd.f32 %v416_v62, %v643_v6  ;;  %v228_v10 = vmax.f32 %v164_v43, %v196_v1  ;;  %v248_v13 = vrot.slane %v168_v52, 2  ;;  %v139_v14 = vpop.f32.mrf.mxu2  ;;  %v399_v20 = vsel %vm396_vm4, %v382_v3, %v332_v0  ;;  %v151_v40 = vpop.f32.mrf.mxu3 }
  0xa9   :  { %v304_v15 = vrot.slane %v272_v4, 1  ;;  %v336_v16 = vrot.slane %v272_v4, 2  ;;  %v369_v17 = vsel %vm362_vm2, %v224_v58, %v272_v4  ;;  %v232_v19 = vmax.f32 %v168_v52, %v200_v5 }
  0xaa   :  { %420 = vst [vmem:[#allocation2 + $0x10] sm:$0xf] %v418_v8  ;;  %v276_v21 = vmax.f32 %v228_v10, %v244_v11  ;;  %v189_v22 = vrot.slane %v157_v60, 1  ;;  %v161_v23 = vmax.f32 %v127_v7, 0.0  ;;  %v689_v24 = vsel %vm396_vm4, %v392_v49, %v342_v18 }
  0xab   :  { %v386_v25 = vsel %vm379_vm3, %v369_v17, %v304_v15  ;;  %v280_v27 = vmax.f32 %v232_v19, %v248_v13  ;;  %v165_v29 = vmax.f32 %v139_v14, 0.0  ;;  %v402_v30 = vsel %vm396_vm4, %v385_v53, %v335_v50 }
  0xac   :  { %v403_v31 = vsel %vm396_vm4, %v386_v25, %v336_v16  ;;  %v308_v32 = vrot.slane %v276_v21, 1  ;;  %v237_v33 = vrot.slane %v157_v60, 2  ;;  %v343_v61 = vrot.slane %v667_v42, 2 }
  0xad   :  { %v393_v18 = vsel %vm379_vm3, %v376_v2, %v311_v63  ;;  %v421_v34 = vmax.f32 %v659_v26, %v399_v20  ;;  %v373_v35 = vsel %vm362_vm2, %v228_v10, %v276_v21  ;;  %v221_v36 = vmax.f32 %v157_v60, %v189_v22 }
  0xae   :  { %v193_v37 = vrot.slane %v161_v23, 1  ;;  %v241_v38 = vrot.slane %v161_v23, 2  ;;  %v445_v39 = vrot.slane %v695_v28, 4  ;;  %v440_v41 = vmax.f32 %v402_v30, %v403_v31 }
  0xaf   :  { %v340_v43 = vrot.slane %v276_v21, 2  ;;  %v312_v44 = vrot.slane %v280_v27, 1  ;;  %v197_v45 = vrot.slane %v165_v29, 1  ;;  %v390_v46 = vsel %vm379_vm3, %v373_v35, %v308_v32 }
  0xb0   :  { %v344_v47 = vrot.slane %v280_v27, 2  ;;  %v269_v42 = vmax.f32 %v221_v36, %v237_v33  ;;  %v225_v48 = vmax.f32 %v161_v23, %v193_v37  ;;  %v377_v49 = vsel %vm362_vm2, %v232_v19, %v280_v27 }
  0xb1   :  { %v229_v26 = vmax.f32 %v165_v29, %v197_v45  ;;  %v245_v50 = vrot.slane %v165_v29, 2  ;;  %v169_v51 = vmax.f32 %v151_v40, 0.0  ;;  %v407_v56 = vsel %vm396_vm4, %v390_v46, %v340_v43 }
  0xb2   :  { %v301_v52 = vrot.slane %v269_v42, 1  ;;  %v333_v53 = vrot.slane %v269_v42, 2  ;;  %v366_v54 = vsel %vm362_vm2, %v221_v36, %v269_v42  ;;  %v273_v55 = vmax.f32 %v225_v48, %v241_v38 }
  0xb3   :  { %v277_v58 = vmax.f32 %v229_v26, %v245_v50  ;;  %v201_v59 = vrot.slane %v169_v51, 1  ;;  %v249_v60 = vrot.slane %v169_v51, 2  ;;  %v422_v13 = vmax.f32 %v676_v57, %v407_v56 }
  0xb4   :  { %v383_v62 = vsel %vm379_vm3, %v366_v54, %v301_v52  ;;  %v305_v63 = vrot.slane %v273_v55, 1  ;;  %v337_v0 = vrot.slane %v273_v55, 2  ;;  %v370_v1 = vsel %vm362_vm2, %v225_v48, %v273_v55 }
  0xb5   :  { %v400_v2 = vsel %vm396_vm4, %v383_v62, %v333_v53  ;;  %v309_v3 = vrot.slane %v277_v58, 1  ;;  %v341_v4 = vrot.slane %v277_v58, 2  ;;  %v374_v5 = vsel %vm362_vm2, %v229_v26, %v277_v58 }
  0xb6   :  { %v423_v7 = vmax.f32 %v421_v34, %v400_v2  ;;  %v432_v8 = vmax.f32 %v400_v2, %v646_v9  ;;  %v387_v10 = vsel %vm379_vm3, %v370_v1, %v305_v63  ;;  %v233_v11 = vmax.f32 %v169_v51, %v201_v59 }
  0xb7   :  { %v394_v14 = vsel %vm379_vm3, %v377_v49, %v312_v44  ;;  %v404_v15 = vsel %vm396_vm4, %v387_v10, %v337_v0  ;;  %v391_v16 = vsel %vm379_vm3, %v374_v5, %v309_v3  ;;  %v410_v25 = vsel %vm396_vm4, %v393_v18, %v343_v61 }
  0xb8   :  { %v428_v17 = vadd.f32 %v426_v12, %v423_v7  ;;  %v434_v19 = vmax.f32 %v432_v8, %v402_v30  ;;  %v442_v20 = vmax.f32 %v440_v41, %v404_v15  ;;  %v408_v21 = vsel %vm396_vm4, %v391_v16, %v341_v4 }
  0xb9   :  { %v424_v22 = vmax.f32 %v422_v13, %v408_v21  ;;  %v433_v9 = vmax.f32 %v408_v21, %v689_v24  ;;  %v281_v23 = vmax.f32 %v233_v11, %v249_v60  ;;  %v411_v57 = vsel %vm396_vm4, %v394_v14, %v344_v47 }
  0xba   :  { %430 = vst [vmem:[#allocation2 + $0x4] sm:$0xf] %v428_v17  ;;  %v436_v27 = vadd.f32 %v434_v19, %v695_v28  ;;  %v447_v29 = vadd.f32 %v445_v39, %v442_v20  ;;  %v441_v34 = vmax.f32 %v410_v25, %v411_v57 }
  0xbb   :  { %v429_v30 = vadd.f32 %v426_v12, %v424_v22  ;;  %v435_v31 = vmax.f32 %v433_v9, %v410_v25  ;;  %v313_v32 = vrot.slane %v281_v23, 1  ;;  %v345_v33 = vrot.slane %v281_v23, 2 }
  0xbc   :  { %438 = vst [vmem:[#allocation2 + $0x8] sm:$0xf] %v436_v27  ;;  %v378_v24 = vsel %vm362_vm2, %v233_v11, %v281_v23 }
  0xbd   :  { %449 = vst [vmem:[#allocation2 + $0xc] sm:$0xf] %v447_v29  ;;  %v437_v61 = vadd.f32 %v435_v31, %v695_v28  ;;  %v395_v18 = vsel %vm379_vm3, %v378_v24, %v313_v32 }
  0xbe   :  { %431 = vst [vmem:[#allocation2 + $0x14] sm:$0xf] %v429_v30  ;;  %v412_v6 = vsel %vm396_vm4, %v395_v18, %v345_v33 }
  0xbf   :  { %439 = vst [vmem:[#allocation2 + $0x18] sm:$0xf] %v437_v61  ;;  %v443_v12 = vmax.f32 %v441_v34, %v412_v6 }
  0xc1   :  { %v448_v35 = vadd.f32 %v445_v39, %v443_v12 }
  0xc3   :  { %450 = vst [vmem:[#allocation2 + $0x1c] sm:$0xf] %v448_v35 }
  0xc4   :  { %463 = dma.vmem_to_hbm [thread:$0]  %s456_s28, 512, %s458_s4, [#allocation3], %s531_s5, %s531_s5, %s532_s6  }
  0xc5   :  { %528 = dma.done.wait [#allocation3], 512  }
  0xc6   :  { %529 = vsyncadd [#allocation3], 4294966784 }
  0xc7   :  { %468 = vsyncpa [#allocation3], 1 }

</bundles_post_ra>
